<compile_context>
chip_gen: v7x
topology: tpu7x:2x2x1
jax: 0.10.0
libtpu: 0.0.40
codegen_flags: <defaults>
</compile_context>

<pallas_src>
import jax
import jax.numpy as jnp
from jax import lax
from jax.experimental import pallas as pl
from jax.experimental.pallas import tpu as pltpu

_LANE = 128


def _embed_kernel(x_ref, w_ref, pos_ref, o_ref):
    # x_ref:   (1, TM, K) bf16     w_ref: (K, D) bf16
    # pos_ref: (TM, D)   f32       o_ref: (1, TM, D)
    acc = jnp.dot(x_ref[0], w_ref[...], preferred_element_type=jnp.float32)
    acc = acc + pos_ref[...]
    o_ref[0] = acc.astype(o_ref.dtype)


def _padded_k(k):
    # Lane-dense contraction dim: pad to a multiple of 128 when it is at least
    # one lane wide but misaligned (e.g. patch 14 -> K=588 -> 640).
    if k >= _LANE and k % _LANE != 0:
        return ((k + _LANE - 1) // _LANE) * _LANE
    return k


def _pick_patch_tile(num_patches, target):
    # Largest divisor of num_patches that is <= target and a multiple of 8
    # (sublane); fall back to the full dim (block == array always compiles).
    if num_patches <= target:
        return num_patches
    for tm in range(target, 7, -1):
        if tm % 8 == 0 and num_patches % tm == 0:
            return tm
    return num_patches


def prepare_siglip_embedding_params(conv_weight, conv_bias, pos_embedding,
                                    *, param_dtype=jnp.bfloat16):
    """One-time (init-time) parameter preprocessing.

    conv_weight  : (D, C, P, P) PyTorch Conv2d layout
    conv_bias    : (D,)
    pos_embedding: (num_positions, D)
    returns (w_kd, pos_plus_bias): (Kp, D) param_dtype, (num_positions, D) f32
    """
    D, C, P, _ = conv_weight.shape
    K = C * P * P
    Kp = _padded_k(K)
    w = conv_weight.reshape(D, K).T              # (K, D), rows in (c, kh, kw) order
    if Kp != K:
        w = jnp.pad(w, ((0, Kp - K), (0, 0)))    # zero rows -> no contribution
    w = w.astype(param_dtype)
    pos_plus_bias = (pos_embedding.astype(jnp.float32)
                     + conv_bias.astype(jnp.float32)[None, :])
    return w, pos_plus_bias


def siglip_vision_embeddings(pixel_values, w_kd, pos_plus_bias, *, patch_size,
                             compute_dtype=jnp.bfloat16):
    """pixel_values : (B, C, H, W) NCHW
       w_kd         : (Kp, D) from prepare_siglip_embedding_params
       pos_plus_bias: (num_patches, D) f32
       returns      : (B, num_patches, D) in pixel_values.dtype
    """
    B, C, H, W = pixel_values.shape
    Kp, D = w_kd.shape
    P = patch_size
    gh, gw = H // P, W // P
    num_patches = gh * gw
    K = C * P * P
    assert pos_plus_bias.shape == (num_patches, D)

    # --- glue: patchify NCHW -> (B, num_patches, K), (c, kh, kw) feature order.
    # The bf16 cast is written here so XLA fuses it with the transpose (one HBM pass).
    # TODO(synk): with NHWC input upstream (or allow_input_fusion) this separate
    # HBM round-trip for the activations could be removed entirely.
    x = pixel_values.reshape(B, C, gh, P, gw, P).transpose(0, 2, 4, 1, 3, 5)
    patches = x.reshape(B, num_patches, K).astype(compute_dtype)
    if Kp != K:
        patches = jnp.pad(patches, ((0, 0), (0, 0), (0, Kp - K)))

    # --- patch-tile size: match the MXU (256 on v6e/v7x, 128 on v5e). ---
    try:
        kind = jax.devices()[0].device_kind.lower()
    except Exception:  # pragma: no cover
        kind = ""
    target_tm = 128 if "v5" in kind else 256
    tm = _pick_patch_tile(num_patches, target_tm)
    grid = (B, num_patches // tm)

    out_dtype = pixel_values.dtype
    out_itemsize = jnp.dtype(out_dtype).itemsize

    # VMEM budget: double-buffered blocks + headroom (v7x physical is 64 MiB).
    block_bytes = (2 * tm * Kp * patches.dtype.itemsize
                   + 2 * Kp * D * w_kd.dtype.itemsize
                   + 2 * tm * D * 4
                   + 2 * tm * D * out_itemsize)
    vmem_limit = int(min(max(2 * block_bytes, 16 * 1024 * 1024),
                         64 * 1024 * 1024))

    cost = pl.CostEstimate(
        flops=2 * B * num_patches * Kp * D,
        transcendentals=0,
        bytes_accessed=(patches.size * patches.dtype.itemsize
                        + w_kd.size * w_kd.dtype.itemsize
                        + pos_plus_bias.size * 4
                        + B * num_patches * D * out_itemsize),
    )

    return pl.pallas_call(
        _embed_kernel,
        out_shape=jax.ShapeDtypeStruct((B, num_patches, D), out_dtype),
        grid_spec=pltpu.PrefetchScalarGridSpec(
            num_scalar_prefetch=0,
            grid=grid,
            in_specs=[
                pl.BlockSpec((1, tm, Kp), lambda b, m: (b, m, 0)),   # patches
                pl.BlockSpec((Kp, D), lambda b, m: (0, 0)),          # weight (resident)
                pl.BlockSpec((tm, D), lambda b, m: (m, 0)),          # pos + bias
            ],
            out_specs=pl.BlockSpec((1, tm, D), lambda b, m: (b, m, 0)),
        ),
        compiler_params=pltpu.CompilerParams(
            dimension_semantics=("parallel", "parallel"),
            vmem_limit_bytes=vmem_limit,
        ),
        cost_estimate=cost,
    )(patches, w_kd, pos_plus_bias)


def _reference(pixel_values, conv_weight, conv_bias, pos_embedding, *, patch_size):
    # Pure-JAX f32 reference with exact PyTorch semantics (NCHW, valid, stride=P).
    conv = lax.conv_general_dilated(
        pixel_values, conv_weight,
        window_strides=(patch_size, patch_size),
        padding="VALID",
        dimension_numbers=("NCHW", "OIHW", "NCHW"),
    ) + conv_bias[None, :, None, None]
    B, D, gh, gw = conv.shape
    emb = conv.reshape(B, D, gh * gw).transpose(0, 2, 1)   # flatten(2).transpose(1,2)
    return emb + pos_embedding[None, :, :]


if __name__ == "__main__":
    # Small SiglipVisionConfig-like shapes.
    batch = 2
    num_channels = 3
    image_size = 16
    patch_size = 4
    hidden_size = 32
    num_patches = (image_size // patch_size) ** 2        # 16

    key = jax.random.PRNGKey(0)
    k_px, k_w, k_b, k_pos = jax.random.split(key, 4)

    pixel_values = jax.random.normal(
        k_px, (batch, num_channels, image_size, image_size), dtype=jnp.float32)
    conv_weight = 0.02 * jax.random.normal(
        k_w, (hidden_size, num_channels, patch_size, patch_size), dtype=jnp.float32)
    conv_bias = 0.01 * jax.random.normal(k_b, (hidden_size,), dtype=jnp.float32)
    pos_embedding = 0.02 * jax.random.normal(
        k_pos, (num_patches, hidden_size), dtype=jnp.float32)

    # One-time param prep (bf16 weight transpose + conv bias folded into positions).
    w_kd, pos_plus_bias = prepare_siglip_embedding_params(
        conv_weight, conv_bias, pos_embedding)

    out = siglip_vision_embeddings(
        pixel_values, w_kd, pos_plus_bias, patch_size=patch_size)
    out = jax.block_until_ready(out)

    ref = _reference(
        pixel_values, conv_weight, conv_bias, pos_embedding, patch_size=patch_size)
    assert out.shape == (batch, num_patches, hidden_size)
    # bf16 matmul operands vs f32 reference -> loosened tolerance.
    assert jnp.allclose(out, ref, atol=2e-2, rtol=2e-2), "mismatch vs reference"

    print("KERNEL_OK")
</pallas_src>

<mosaic_0001>
module attributes {stable_mosaic.version = 11 : i64} {
  func.func @_embed_kernel(%arg0: i32, %arg1: i32, %arg2: memref<1x16x48xbf16, #tpu.memory_space<vmem>>, %arg3: memref<48x32xbf16, #tpu.memory_space<vmem>>, %arg4: memref<16x32xf32, #tpu.memory_space<vmem>>, %arg5: memref<1x16x32xf32, #tpu.memory_space<vmem>>) attributes {dimension_semantics = [#tpu.dimension_semantics<parallel>, #tpu.dimension_semantics<parallel>], iteration_bounds = array<i64: 2, 1>, scalar_prefetch = 0 : i64, scratch_operands = 0 : i64, tpu.core_type = #tpu.core_type<tc>, window_params = [{transform_indices = @transform_0, window_bounds = array<i64: 1, 16, 48>}, {pipeline_mode = #tpu.pipeline_mode<synchronous>, transform_indices = @transform_1, window_bounds = array<i64: 48, 32>}, {transform_indices = @transform_2, window_bounds = array<i64: 16, 32>}, {transform_indices = @transform_3, window_bounds = array<i64: 1, 16, 32>}]} {
    %c0 = arith.constant 0 : index
    %c0_0 = arith.constant 0 : index
    %c0_1 = arith.constant 0 : index
    %0 = vector.load %arg2[%c0, %c0_0, %c0_1] : memref<1x16x48xbf16, #tpu.memory_space<vmem>>, vector<1x16x48xbf16>
    %1 = vector.shape_cast %0 : vector<1x16x48xbf16> to vector<16x48xbf16>
    %c0_2 = arith.constant 0 : index
    %c0_3 = arith.constant 0 : index
    %2 = vector.load %arg3[%c0_2, %c0_3] : memref<48x32xbf16, #tpu.memory_space<vmem>>, vector<48x32xbf16>
    %cst = arith.constant dense<0.000000e+00> : vector<16x32xf32>
    %3 = tpu.matmul %1, %2, %cst {dimension_numbers = #tpu.dot_dimension_numbers<[1], [0], [0], [1], [0, 0, 1, 1], [], []>} : vector<16x48xbf16>, vector<48x32xbf16>, vector<16x32xf32> -> vector<16x32xf32>
    %c0_4 = arith.constant 0 : index
    %c0_5 = arith.constant 0 : index
    %4 = vector.load %arg4[%c0_4, %c0_5] : memref<16x32xf32, #tpu.memory_space<vmem>>, vector<16x32xf32>
    %5 = arith.addf %3, %4 : vector<16x32xf32>
    %c0_6 = arith.constant 0 : index
    %c0_7 = arith.constant 0 : index
    %c0_8 = arith.constant 0 : index
    %6 = vector.load %arg5[%c0_6, %c0_7, %c0_8] : memref<1x16x32xf32, #tpu.memory_space<vmem>>, vector<1x16x32xf32>
    %7 = vector.shape_cast %6 : vector<1x16x32xf32> to vector<16x32xf32>
    %8 = vector.shape_cast %5 : vector<16x32xf32> to vector<1x16x32xf32>
    tpu.vector_store %arg5[%c0_6, %c0_7, %c0_8], %8 {strides = array<i32>} : memref<1x16x32xf32, #tpu.memory_space<vmem>>, vector<1x16x32xf32>,
    return
  }
  func.func @transform_0(%arg0: i32, %arg1: i32) -> (i32, i32, i32) {
    %c0_i32 = arith.constant 0 : i32
    %c0_i32_0 = arith.constant 0 : i32
    return %arg0, %arg1, %c0_i32 : i32, i32, i32
  }
  func.func @transform_1(%arg0: i32, %arg1: i32) -> (i32, i32) {
    %c0_i32 = arith.constant 0 : i32
    %c0_i32_0 = arith.constant 0 : i32
    %c0_i32_1 = arith.constant 0 : i32
    return %c0_i32, %c0_i32_0 : i32, i32
  }
  func.func @transform_2(%arg0: i32, %arg1: i32) -> (i32, i32) {
    %c0_i32 = arith.constant 0 : i32
    %c0_i32_0 = arith.constant 0 : i32
    return %arg1, %c0_i32 : i32, i32
  }
  func.func @transform_3(%arg0: i32, %arg1: i32) -> (i32, i32, i32) {
    %c0_i32 = arith.constant 0 : i32
    %c0_i32_0 = arith.constant 0 : i32
    return %arg0, %arg1, %c0_i32 : i32, i32, i32
  }
}

</mosaic_0001>

<bundles_post_ra>
// kernel: tpu_custom_call.1
= control target key start
LH: loop header
LB: loop body
LE: loop exit
PB: predicated region body
PF: predicated region fallthrough
CT: control target
= control target key end

     0   :  { %8 = vsyncpa [#allocation3], 0  ;;  %s747_s0 = inlined_call_operand.vmem [shape: bf16[2,16,48], index: 0, kind: input, shape index: {}]   ;;  %s748_s1 = inlined_call_operand.vmem [shape: bf16[48,32], index: 1, kind: input, shape index: {}]   ;;  %s749_s2 = inlined_call_operand.vmem [shape: f32[16,32], index: 2, kind: input, shape index: {}]   ;;  %s750_s3 = inlined_call_operand.hbm [shape: f32[2,16,32], index: 3, kind: output, shape index: {}]  }
   0x1   :  { %10 = vsyncpa [#allocation3 + $0x1], 0  ;;  %s617_s12 = smov 0   ;;  %s619_s13 = smov 0  }
   0x2   :  { %s621_s14 = smov 0   ;;  %s623_s15 = smov 0  }
   0x3   :  { %s625_s16 = smov 0   ;;  %s627_s17 = smov 0  }
   0x4 LB: > { %s414_s18 = sadd.s32 4294967295, %s590_s17   ;;  %s415_s19 = sadd.s32 4294967294, %s590_s17   ;;  %s590_s17 = sphi %s627_s17, %s16_s17   ;;  %s586_s16 = sphi %s625_s16, %s757_s16   ;;  %s582_s15 = sphi %s623_s15, %s756_s15   ;;  %s578_s14 = sphi %s621_s14, %s755_s14   ;;  %s574_s13 = sphi %s619_s13, %s754_s13   ;;  %s570_s12 = sphi %s617_s12, %s753_s12  }
   0x5   : > { %s28_s20 = sadd.s32 1, %s586_s16  ;;  %s112_s21 = sadd.s32 1, %s578_s14 }
   0x6   : > { %p30_p0 = scmp.ge.s32.totalorder %s28_s20, 2  ;;  %p122_p1 = scmp.ne.s32.totalorder %s578_s14, %s574_s13 }
   0x7   : > { %p123_p2 = scmp.eq.s32.totalorder %s414_s18, 1  ;;  %p128_p3 = scmp.ne.s32.totalorder %s574_s13, %s570_s12 }
   0x8   : > { %s759_s20 = smov (%p30_p0, %s28_s20), 0  ;;  %p129_p5 = scmp.eq.s32.totalorder %s415_s19, 1 }
   0x9   : > { %p657_p4 = por %p123_p2, %p122_p1  ;;  %s107_s23 = ssub.s32 %s586_s16, %s759_s20 }
   0xa   : > { %p419_p6 = scmp.ge.s32.totalorder %s590_s17, 1  ;;  %p110_p7 = scmp.eq.s32.totalorder %s107_s23, 0 }
   0xb   : > { %p664_p8 = por %p129_p5, %p128_p3  ;;  %p172_p9 = scmp.lt.s32.totalorder %s590_s17, 3 }
   0xc   : > { %s670_s25 = scalar_select %p110_p7, %s578_s14, %s112_s21  }
   0xd   : > { %p173_p10 = pnand %p419_p6, %p172_p9 }
   0xe   : > { %v508_v0 = vld [vmem:[%s748_s1] sm:$0xff] (!%p173_p10)   ;;  %v592_v1 = vmov (!%p173_p10), 0.0   ;;  %v509_v2 = vld [vmem:[%s748_s1 + $0x8] sm:$0xff] (!%p173_p10)   ;;  %vm593_vm0 = vmmov (!%p173_p10), 0   ;;  %p206_p11 = scmp.lt.s32.totalorder (!%p173_p10), %s582_s15, 1  ;;  %v510_v3 = vld [vmem:[%s748_s1 + $0x10] sm:$0xff] (!%p173_p10)  }
   0xf   : > { %176 = sbr.rel (%p173_p10) target bundleno = 258 (0x102), region = 32  ;;  %439 = vmatprep.subr.bf16.mxu0 (!%p173_p10), %v592_v1  ;;  %445 = vmatprep.mubr.msk.bf16.mxu0 (!%p173_p10), %vm593_vm0, %v592_v1  ;;  %vm256_vm1 = vcmask (!%p173_p10), 392192   ;;  %s202_s10 = sand.u32 (!%p173_p10), 1, %s574_s13   ;;  %v231_v5 = vld [vmem:[%s749_s2] sm:$0xff] (!%p173_p10)  ;;  %vm301_vm2 = vcmask (!%p173_p10), 261120   ;;  %v232_v7 = vld [vmem:[%s749_s2 + $0x8] sm:$0xff] (!%p173_p10) }
  0x10   : > { %440 = vmatpush3.bf16.msra.mxu0 (!%p173_p10), %v508_v0  ;;  %s420_s11 = sshll.u32 (!%p173_p10), %s202_s10, 4  ;;  %s434_s26 = sshll.u32 (!%p173_p10), %s582_s15, 8 }
  0x11   : > { %441 = vmatprep.subr.bf16.mxu0 (!%p173_p10), %v592_v1  ;;  %s204_s21 = scalar_lea.vmem (!%p173_p10), [#allocation2], %s420_s11  ;;  %s699_s4 = scalar_lea.hbm (!%p173_p10), %s750_s3, %s434_s26 }
  0x12   : > { %s320_s23 = sshll.u32 (!%p173_p10), %s204_s21, 4  ;;  %s694_s23 = int_to_ptr.vmem [resolvable:$true] %s320_s23 }
  0x13   : > { %s512_s5 = scalar_lea.vmem (!%p173_p10), %s694_s23, 256 }
  0x14   : > { %442 = vmatpush3.bf16.msra.mxu0 (!%p173_p10), %v509_v2  ;;  %p513_p12 = scmp.ne.s32.totalorder (!%p173_p10), %s694_s23, %s512_s5 }
  0x15   : > { %443 = vmatprep.subr.bf16.mxu0 (!%p173_p10), %v592_v1 }
  0x16   : > { %s207_s30 = scalar_select %p206_p11, %s582_s15, 1 }
  0x17   : > { %s701_s15 = scalar_lea.sflag [#allocation3], %s202_s10  ;;  %p514_p13 = pnand %p513_p12, %p657_p4 }
  0x18   : > { %s433_s6 = sshll.u32 %s207_s30, 3  ;;  %444 = vmatpush3.bf16.msra.mxu0 %v510_v3 }
  0x19   : > { %s213_s9 = scalar_lea.vmem %s747_s0, %s433_s6  ;;  %p515_p0 = pneg %p514_p13 }
  0x1a   : > { %v511_v4 = vld [vmem:[%s213_s9] sm:$0xff]   ;;  %s594_s6 = smov [#allocation2]  }
  0x1b   : > { %446 = vmatmul.mubr.msk.bf16.vlgmr.msra.gmra.mrb[0].mxu0 %vm256_vm1, %v511_v4  ;;  %s516_s7 = sshll.u32 %s594_s6, 4  ;;  %s517_s7 = int_to_ptr.vmem [resolvable:$false] %s516_s7 }
  0x1c   : > { %s518_s8 = scalar_lea.vmem %s517_s7, 512  ;;  %p519_p1 = scmp.lt.s32.totalorder %s694_s23, %s517_s7 }
  0x1d   : > { %p520_p2 = scmp.lt.s32.totalorder %s518_s8, %s512_s5 }
  0x1f   : > { %p521_p3 = por %p520_p2, %p519_p1 }
  0x21   : > { %p522_p5 = pnand %p521_p3, %p515_p0 }
  0xee   : > { %v294_v6 = vpop.f32.mrb[0].mxu0 }
  0xef   : > { %v295_v8 = vadd.f32 %v294_v6, %v231_v5  ;;  %v447_v9 = vpop.f32.mrb[1].mxu0 }
  0xf0   : > { %v297_v10 = vpop.f32.mrb[2].mxu0 }
  0xf1   : > { %302 = vst.msk [vmem:[%s204_s21] sm:$0xff] %vm301_vm2, %v295_v8  ;;  %v298_v11 = vadd.f32 %v297_v10, %v232_v7  ;;  %v448_v12 = vpop.f32.mrb[3].mxu0 }
  0xf3   : > { %303 = vst.msk [vmem:[%s204_s21 + $0x8] sm:$0xff] %vm301_vm2, %v298_v11 }
  0xf4   : > { %525 = shalt.err (!%p522_p5)
}
  0xf5   : > { %s526_s9 = scalar_lea.hbm %s699_s4, 256  ;;  %s530_s18 = scalar_lea.hbm %s750_s3, 512 }
  0xf6   : > { %p527_p6 = scmp.ne.s32.totalorder %s699_s4, %s526_s9  ;;  %p531_p10 = scmp.lt.u32.totalorder %s699_s4, %s750_s3 }
  0xf7   : > { %p532_p11 = scmp.lt.u32.totalorder %s530_s18, %s526_s9  ;;  %p534_p13 = scmp.lt.u32.totalorder %s526_s9, %s699_s4 }
  0xf8   : > { %p528_p7 = pnand %p527_p6, %p657_p4 }
  0xf9   : > { %p533_p12 = por %p532_p11, %p531_p10 }
  0xfa   : > { %p529_p9 = pneg %p528_p7 }
  0xfb   : > { %p535_p0 = por %p534_p13, %p533_p12 }
  0xfd   : > { %p536_p1 = pnand %p535_p0, %p529_p9 }
  0xff   : > { %539 = shalt.err (!%p536_p1)
}
 0x100   : > { %s595_s26 = smov 128   ;;  %s596_s27 = smov 8  }
 0x101   : > { %449 = dma.vmem_to_hbm [thread:$0]  (%p657_p4), %s694_s23, 256, %s699_s4, %s701_s15, %s595_s26, %s595_s26, %s596_s27  }
 0x102 PF: > { %p455_p2 = scmp.ge.s32.totalorder %s590_s17, 2  ;;  %s335_s28 = sand.u32 1, %s570_s12  }
 0x103   : > { %s336_s29 = scalar_lea.sflag [#allocation3], %s335_s28 }
 0x104   : > { %p452_p3 = pnand %p455_p2, %p664_p8 }
 0x106   : > { %565 = dma.done.wait (!%p452_p3), %s336_s29, 256  }
 0x107   : > { %567 = vsyncadd (!%p452_p3), %s336_s29, 4294967040  ;;  %s16_s17 = sadd.s32 1, %s590_s17   ;;  %s753_s12 = smov %s574_s13 }
 0x108   : > { %p13_p5 = scmp.ge.s32.totalorder %s16_s17, 4   ;;  %s754_s13 = smov %s578_s14 }
 0x109   : > { %s755_s14 = smov %s670_s25  ;;  %s756_s15 = smov %s586_s16 }
 0x10a   : > { %s757_s16 = smov %s759_s20  ;;  %15 = sbr.rel (!%p13_p5) target bundleno = 4 (0x4), region = 70 }
 0x111   :  { %341 = vsyncpa [#allocation3], 1 }
 0x112   :  { %343 = vsyncpa [#allocation3 + $0x1], 1 }

</bundles_post_ra>
